<compile_context>
chip_gen: v6e
topology: v6e:2x2x1
jax: 0.10.0
libtpu: 0.0.40
codegen_flags: <defaults>
</compile_context>

<pallas_src>
import jax
import jax.numpy as jnp
from jax.experimental import pallas as pl
from jax.experimental.pallas import tpu as pltpu


def soft_q_kernel(x_ref, w1_ref, b1_ref, w2_ref, b2_ref, w3_ref, b3_ref, o_ref):
    # x_ref:  (in_dim, tb) bf16  — batch on lanes.
    # w1_ref: (L, in_dim) bf16, w2_ref: (L, L) bf16  — transposed weights.
    # b1/b2:  (L, 1) f32, w3: (L, 1) f32, b3: (1, 1) f32.
    # Layer 1: single MXU dot, bf16 in / f32 accumulate.  N dim = tb (lane-full).
    h1 = jnp.dot(w1_ref[...], x_ref[...], preferred_element_type=jnp.float32)
    h1 = jnp.maximum(h1 + b1_ref[...], 0.0)                     # (L, tb) f32

    # Layer 2.
    h2 = jnp.dot(w2_ref[...], h1.astype(w2_ref.dtype),
                 preferred_element_type=jnp.float32)
    h2 = jnp.maximum(h2 + b2_ref[...], 0.0)                     # (L, tb) f32

    # Output head (out_features == 1): lane-full VPU multiply + sublane reduce.
    q = jnp.sum(h2 * w3_ref[...], axis=0, keepdims=True) + b3_ref[...]  # (1, tb)
    o_ref[...] = q.astype(o_ref.dtype)


def _padded_hbm_bytes(shape, dtype):
    """Bytes of a 2-D array in HBM after (8*32/itemsize, 128) tile padding."""
    r, c = shape
    itemsize = jnp.dtype(dtype).itemsize
    sub = 32 // itemsize                      # 8 for f32, 16 for bf16
    rp = -(-r // sub) * sub
    cp = -(-c // 128) * 128
    return rp * cp * itemsize


def soft_q_forward(obs, actions, params, *, block_cols=512):
    """Forward pass of SoftQNetwork.

    obs: (B, obs_dim) f32, actions: (B, act_dim) f32.
    params: (w1, b1, w2, b2, w3, b3); weights stored [in, out], biases [1, out].
    Returns (B, 1) f32 Q-values.
    """
    w1, b1, w2, b2, w3, b3 = params
    B, obs_dim = obs.shape
    act_dim = actions.shape[1]
    in_dim = obs_dim + act_dim
    L = w1.shape[1]

    # Fused concat + transpose + bf16 cast: one wrapper op, feature-major x.
    x_t = jnp.concatenate([obs, actions], axis=1).T.astype(jnp.bfloat16)  # (in_dim, B)

    # Batch tiling along the lane axis (tb is a multiple of 128).
    tb = min(block_cols, pl.cdiv(B, 128) * 128)
    g = pl.cdiv(B, tb)
    b_pad = g * tb
    if b_pad != B:
        x_t = jnp.pad(x_t, ((0, 0), (0, b_pad - B)))

    # Transposed weights (out, in); biases / head as column vectors.
    w1t = w1.T.astype(jnp.bfloat16)                    # (L, in_dim)
    w2t = w2.T.astype(jnp.bfloat16)                    # (L, L)
    w3c = w3.reshape(L, 1).astype(jnp.float32)         # (L, 1)
    b1c = b1.reshape(L, 1).astype(jnp.float32)
    b2c = b2.reshape(L, 1).astype(jnp.float32)
    b3c = b3.reshape(1, 1).astype(jnp.float32)

    out_shape = (1, b_pad)
    cost = pl.CostEstimate(
        flops=2 * b_pad * (in_dim * L + L * L + L),
        transcendentals=0,
        bytes_accessed=(
            _padded_hbm_bytes((in_dim, b_pad), jnp.bfloat16)   # x stream
            + _padded_hbm_bytes(out_shape, jnp.float32)        # q output
            + _padded_hbm_bytes((L, in_dim), jnp.bfloat16)
            + _padded_hbm_bytes((L, L), jnp.bfloat16)
            + 3 * _padded_hbm_bytes((L, 1), jnp.float32)
            + _padded_hbm_bytes((1, 1), jnp.float32)))

    resident = lambda shape: pl.BlockSpec(shape, lambda i: (0, 0))

    out = pl.pallas_call(
        soft_q_kernel,
        out_shape=jax.ShapeDtypeStruct(out_shape, jnp.float32),
        grid=(g,),
        in_specs=[
            pl.BlockSpec((in_dim, tb), lambda i: (0, i)),   # x tile (lane-full)
            resident((L, in_dim)),                          # W1^T
            resident((L, 1)),                               # b1
            resident((L, L)),                               # W2^T
            resident((L, 1)),                               # b2
            resident((L, 1)),                               # W3 column
            resident((1, 1)),                               # b3
        ],
        out_specs=pl.BlockSpec((1, tb), lambda i: (0, i)),  # lane-dense output
        compiler_params=pltpu.CompilerParams(
            dimension_semantics=("parallel",)),
        cost_estimate=cost,
    )(x_t, w1t, b1c, w2t, b2c, w3c, b3c)

    return out[0, :B][:, None]


def init_params(key, input_dim, layer_size, output_dim=1):
    """Matches MLP.init_weights: xavier_normal_ on weights, PyTorch-default
    uniform on biases.  Weights stored pre-transposed as [in, out]."""
    ks = jax.random.split(key, 6)

    def xavier_normal(k, fan_in, fan_out):
        std = (2.0 / (fan_in + fan_out)) ** 0.5
        return std * jax.random.normal(k, (fan_in, fan_out), dtype=jnp.float32)

    def bias_uniform(k, fan_in, fan_out):
        bound = 1.0 / (fan_in ** 0.5)
        return jax.random.uniform(k, (1, fan_out), dtype=jnp.float32,
                                  minval=-bound, maxval=bound)

    w1 = xavier_normal(ks[0], input_dim, layer_size)
    b1 = bias_uniform(ks[1], input_dim, layer_size)
    w2 = xavier_normal(ks[2], layer_size, layer_size)
    b2 = bias_uniform(ks[3], layer_size, layer_size)
    w3 = xavier_normal(ks[4], layer_size, output_dim)
    b3 = bias_uniform(ks[5], layer_size, output_dim)
    return (w1, b1, w2, b2, w3, b3)


if __name__ == "__main__":
    # Small shapes consistent with the module: obs_dim=12, action_dim=4,
    # layer_size=32, batch=8.
    B, OBS_DIM, ACT_DIM, LAYER_SIZE = 8, 12, 4, 32

    key = jax.random.PRNGKey(0)
    k_obs, k_act, k_par = jax.random.split(key, 3)

    obs = jax.random.normal(k_obs, (B, OBS_DIM), dtype=jnp.float32)
    actions = jax.random.normal(k_act, (B, ACT_DIM), dtype=jnp.float32)
    params = init_params(k_par, OBS_DIM + ACT_DIM, LAYER_SIZE, output_dim=1)

    out = soft_q_forward(obs, actions, params)
    out = jax.block_until_ready(out)

    # Pure-JAX reference with matching numerics (bf16 inputs/weights for the
    # two hidden layers, f32 accumulation, f32 head).
    w1, b1, w2, b2, w3, b3 = params
    x16 = jnp.concatenate([obs, actions], axis=1).astype(jnp.bfloat16)
    h1 = jnp.maximum(
        jnp.dot(x16, w1.astype(jnp.bfloat16),
                preferred_element_type=jnp.float32) + b1, 0.0)
    h2 = jnp.maximum(
        jnp.dot(h1.astype(jnp.bfloat16), w2.astype(jnp.bfloat16),
                preferred_element_type=jnp.float32) + b2, 0.0)
    ref = jnp.dot(h2, w3) + b3

    assert out.shape == (B, 1)
    assert jnp.allclose(out, ref, atol=1e-3, rtol=1e-3), (
        f"max abs err = {jnp.max(jnp.abs(out - ref))}")

    print("KERNEL_OK")
</pallas_src>

<mosaic_0001>
module attributes {stable_mosaic.version = 11 : i64} {
  func.func @soft_q_kernel(%arg0: i32, %arg1: memref<16x128xbf16, #tpu.memory_space<vmem>>, %arg2: memref<32x16xbf16, #tpu.memory_space<vmem>>, %arg3: memref<32x1xf32, #tpu.memory_space<vmem>>, %arg4: memref<32x32xbf16, #tpu.memory_space<vmem>>, %arg5: memref<32x1xf32, #tpu.memory_space<vmem>>, %arg6: memref<32x1xf32, #tpu.memory_space<vmem>>, %arg7: memref<1x1xf32, #tpu.memory_space<vmem>>, %arg8: memref<1x128xf32, #tpu.memory_space<vmem>>) attributes {dimension_semantics = [#tpu.dimension_semantics<parallel>], iteration_bounds = array<i64: 1>, scalar_prefetch = 0 : i64, scratch_operands = 0 : i64, tpu.core_type = #tpu.core_type<tc>, window_params = [{transform_indices = @transform_0, window_bounds = array<i64: 16, 128>}, {pipeline_mode = #tpu.pipeline_mode<synchronous>, transform_indices = @transform_1, window_bounds = array<i64: 32, 16>}, {pipeline_mode = #tpu.pipeline_mode<synchronous>, transform_indices = @transform_2, window_bounds = array<i64: 32, 1>}, {pipeline_mode = #tpu.pipeline_mode<synchronous>, transform_indices = @transform_3, window_bounds = array<i64: 32, 32>}, {pipeline_mode = #tpu.pipeline_mode<synchronous>, transform_indices = @transform_4, window_bounds = array<i64: 32, 1>}, {pipeline_mode = #tpu.pipeline_mode<synchronous>, transform_indices = @transform_5, window_bounds = array<i64: 32, 1>}, {pipeline_mode = #tpu.pipeline_mode<synchronous>, transform_indices = @transform_6, window_bounds = array<i64: 1, 1>}, {transform_indices = @transform_7, window_bounds = array<i64: 1, 128>}]} {
    %c0 = arith.constant 0 : index
    %c0_0 = arith.constant 0 : index
    %0 = vector.load %arg2[%c0, %c0_0] : memref<32x16xbf16, #tpu.memory_space<vmem>>, vector<32x16xbf16>
    %c0_1 = arith.constant 0 : index
    %c0_2 = arith.constant 0 : index
    %1 = vector.load %arg1[%c0_1, %c0_2] : memref<16x128xbf16, #tpu.memory_space<vmem>>, vector<16x128xbf16>
    %cst = arith.constant dense<0.000000e+00> : vector<32x128xf32>
    %2 = tpu.matmul %0, %1, %cst {dimension_numbers = #tpu.dot_dimension_numbers<[1], [0], [0], [1], [0, 0, 1, 1], [], []>} : vector<32x16xbf16>, vector<16x128xbf16>, vector<32x128xf32> -> vector<32x128xf32>
    %c0_3 = arith.constant 0 : index
    %c0_4 = arith.constant 0 : index
    %3 = vector.load %arg3[%c0_3, %c0_4] : memref<32x1xf32, #tpu.memory_space<vmem>>, vector<32x1xf32>
    %4 = vector.broadcast %3 : vector<32x1xf32> to vector<32x128xf32>
    %5 = arith.addf %2, %4 : vector<32x128xf32>
    %cst_5 = arith.constant 0.000000e+00 : f32
    %6 = vector.broadcast %cst_5 : f32 to vector<32x128xf32>
    %7 = arith.maximumf %5, %6 : vector<32x128xf32>
    %c0_6 = arith.constant 0 : index
    %c0_7 = arith.constant 0 : index
    %8 = vector.load %arg4[%c0_6, %c0_7] : memref<32x32xbf16, #tpu.memory_space<vmem>>, vector<32x32xbf16>
    %9 = arith.truncf %7 : vector<32x128xf32> to vector<32x128xbf16>
    %cst_8 = arith.constant dense<0.000000e+00> : vector<32x128xf32>
    %10 = tpu.matmul %8, %9, %cst_8 {dimension_numbers = #tpu.dot_dimension_numbers<[1], [0], [0], [1], [0, 0, 1, 1], [], []>} : vector<32x32xbf16>, vector<32x128xbf16>, vector<32x128xf32> -> vector<32x128xf32>
    %c0_9 = arith.constant 0 : index
    %c0_10 = arith.constant 0 : index
    %11 = vector.load %arg5[%c0_9, %c0_10] : memref<32x1xf32, #tpu.memory_space<vmem>>, vector<32x1xf32>
    %12 = vector.broadcast %11 : vector<32x1xf32> to vector<32x128xf32>
    %13 = arith.addf %10, %12 : vector<32x128xf32>
    %cst_11 = arith.constant 0.000000e+00 : f32
    %14 = vector.broadcast %cst_11 : f32 to vector<32x128xf32>
    %15 = arith.maximumf %13, %14 : vector<32x128xf32>
    %c0_12 = arith.constant 0 : index
    %c0_13 = arith.constant 0 : index
    %16 = vector.load %arg6[%c0_12, %c0_13] : memref<32x1xf32, #tpu.memory_space<vmem>>, vector<32x1xf32>
    %17 = vector.broadcast %16 : vector<32x1xf32> to vector<32x128xf32>
    %18 = arith.mulf %15, %17 : vector<32x128xf32>
    %cst_14 = arith.constant dense<0.000000e+00> : vector<128xf32>
    %19 = vector.multi_reduction <add>, %18, %cst_14 [0] : vector<32x128xf32> to vector<128xf32>
    %20 = vector.shape_cast %19 : vector<128xf32> to vector<1x128xf32>
    %c0_15 = arith.constant 0 : index
    %c0_16 = arith.constant 0 : index
    %21 = vector.load %arg7[%c0_15, %c0_16] : memref<1x1xf32, #tpu.memory_space<vmem>>, vector<1x1xf32>
    %22 = vector.broadcast %21 : vector<1x1xf32> to vector<1x128xf32>
    %23 = arith.addf %20, %22 : vector<1x128xf32>
    %c0_17 = arith.constant 0 : index
    %c0_18 = arith.constant 0 : index
    %24 = vector.load %arg8[%c0_17, %c0_18] : memref<1x128xf32, #tpu.memory_space<vmem>>, vector<1x128xf32>
    tpu.vector_store %arg8[%c0_17, %c0_18], %23 {strides = array<i32>} : memref<1x128xf32, #tpu.memory_space<vmem>>, vector<1x128xf32>,
    return
  }
  func.func @transform_0(%arg0: i32) -> (i32, i32) {
    %c0_i32 = arith.constant 0 : i32
    %c0_i32_0 = arith.constant 0 : i32
    return %c0_i32, %arg0 : i32, i32
  }
  func.func @transform_1(%arg0: i32) -> (i32, i32) {
    %c0_i32 = arith.constant 0 : i32
    %c0_i32_0 = arith.constant 0 : i32
    %c0_i32_1 = arith.constant 0 : i32
    return %c0_i32, %c0_i32_0 : i32, i32
  }
  func.func @transform_2(%arg0: i32) -> (i32, i32) {
    %c0_i32 = arith.constant 0 : i32
    %c0_i32_0 = arith.constant 0 : i32
    %c0_i32_1 = arith.constant 0 : i32
    return %c0_i32, %c0_i32_0 : i32, i32
  }
  func.func @transform_3(%arg0: i32) -> (i32, i32) {
    %c0_i32 = arith.constant 0 : i32
    %c0_i32_0 = arith.constant 0 : i32
    %c0_i32_1 = arith.constant 0 : i32
    return %c0_i32, %c0_i32_0 : i32, i32
  }
  func.func @transform_4(%arg0: i32) -> (i32, i32) {
    %c0_i32 = arith.constant 0 : i32
    %c0_i32_0 = arith.constant 0 : i32
    %c0_i32_1 = arith.constant 0 : i32
    return %c0_i32, %c0_i32_0 : i32, i32
  }
  func.func @transform_5(%arg0: i32) -> (i32, i32) {
    %c0_i32 = arith.constant 0 : i32
    %c0_i32_0 = arith.constant 0 : i32
    %c0_i32_1 = arith.constant 0 : i32
    return %c0_i32, %c0_i32_0 : i32, i32
  }
  func.func @transform_6(%arg0: i32) -> (i32, i32) {
    %c0_i32 = arith.constant 0 : i32
    %c0_i32_0 = arith.constant 0 : i32
    %c0_i32_1 = arith.constant 0 : i32
    return %c0_i32, %c0_i32_0 : i32, i32
  }
  func.func @transform_7(%arg0: i32) -> (i32, i32) {
    %c0_i32 = arith.constant 0 : i32
    %c0_i32_0 = arith.constant 0 : i32
    return %c0_i32, %arg0 : i32, i32
  }
}

</mosaic_0001>

<bundles_post_ra>
// kernel: tpu_custom_call.1
= control target key start
LH: loop header
LB: loop body
LE: loop exit
PB: predicated region body
PF: predicated region fallthrough
CT: control target
= control target key end

     0   :  { %s461_s0 = inlined_call_operand.vmem [shape: bf16[16,128], index: 0, kind: input, shape index: {}]   ;;  %s462_s1 = inlined_call_operand.vmem [shape: bf16[32,16], index: 1, kind: input, shape index: {}]   ;;  %s463_s2 = inlined_call_operand.vmem [shape: f32[32,1], index: 2, kind: input, shape index: {}]   ;;  %s464_s3 = inlined_call_operand.vmem [shape: bf16[32,32], index: 3, kind: input, shape index: {}]   ;;  %s465_s4 = inlined_call_operand.vmem [shape: f32[32,1], index: 4, kind: input, shape index: {}]   ;;  %s466_s5 = inlined_call_operand.vmem [shape: f32[32,1], index: 5, kind: input, shape index: {}]   ;;  %s467_s6 = inlined_call_operand.<no memory space> [shape: f32[1,1], index: 6, kind: input, shape index: {}]   ;;  %s468_s7 = inlined_call_operand.hbm [shape: f32[1,128], index: 7, kind: output, shape index: {}]  }
   0x1   :  { %v12_v0 = vstv %s467_s6 }
   0x2   :  { %13 = vst [vmem:[#allocation2] sm:$0x1] %v12_v0 }
   0x3   :  { %v333_v1 = vld [vmem:[%s461_s0] sm:$0xff]   ;;  %vm76_vm0 = vcmask 130048   ;;  %v335_v3 = vld [vmem:[%s462_s1 + $0x8] sm:$0xff]   ;;  %v360_v4 = vmov 0   ;;  %v38_v5 = vld [vmem:[%s463_s2 + $0x10] sm:$0xff] }
   0x4   :  { %v334_v2 = vld [vmem:[%s462_s1] sm:$0xff]   ;;  %315 = vmatprep.subr.bf16.mxu0 %v333_v1  ;;  %331 = vset.pattern.permute.xlu0 %v360_v4  ;;  %v39_v7 = vld [vmem:[%s463_s2 + $0x18] sm:$0xff]  ;;  %v37_v8 = vld [vmem:[%s463_s2 + $0x8] sm:$0xff] }
   0x5   :  { %316 = vmatpush3.bf16.msra.mxu0 %v333_v1  ;;  %317 = vmatprep.mubr.msk.bf16.mxu0 %vm76_vm0, %v334_v2  ;;  %v36_v6 = vld [vmem:[%s463_s2] sm:$0xff] }
   0x6   :  { %52 = vperm.xlu0 %331, %v38_v5   ;;  %332 = vset.pattern.permute.xlu1 %v360_v4 }
   0x7   :  { %42 = vperm.xlu1 %332, %v36_v6  }
   0x8   :  { %318 = vmatmul.mubr.msk.bf16.vlgmr.msra.gmra.mxu0 %vm76_vm0, %v335_v3 }
   0xa   :  { %57 = vperm.xlu0 %331, %v39_v7  }
   0xb   :  { %14 = vsyncpa [#allocation4], 0  ;;  %v142_v9 = vld [vmem:[%s465_s4] sm:$0xff]  ;;  %47 = vperm.xlu1 %332, %v37_v8   ;;  %v143_v10 = vld [vmem:[%s465_s4 + $0x8] sm:$0xff]  ;;  %vm176_vm1 = vcmask 261120   ;;  %v279_v0 = vlaneseq }
   0xc   :  { %v144_v11 = vld [vmem:[%s465_s4 + $0x10] sm:$0xff]  ;;  %v145_v12 = vld [vmem:[%s465_s4 + $0x18] sm:$0xff]  ;;  %v236_v13 = vld [vmem:[%s466_s5] sm:$0xff] }
   0xd   :  { %v237_v14 = vld [vmem:[%s466_s5 + $0x8] sm:$0xff]  ;;  %v238_v15 = vld [vmem:[%s466_s5 + $0x10] sm:$0xff]  ;;  %v239_v16 = vld [vmem:[%s466_s5 + $0x18] sm:$0xff]  ;;  %v280_v3 = vshrl.u32 %v279_v0, 7 }
   0xe   :  { %148 = vperm.xlu0 %331, %v142_v9   ;;  %v273_v17 = vld [vmem:[#allocation2] sm:$0x1]  ;;  %v337_v37 = vld [vmem:[%s464_s3 + $0x8] sm:$0xff]  }
   0xf   :  { %153 = vperm.xlu1 %332, %v143_v10   ;;  %v336_v18 = vld [vmem:[%s464_s3] sm:$0xff]   ;;  %v281_v6 = vsub.s32 0, %v280_v3  ;;  %s361_s3 = smov [#allocation3]  }
  0x10   :  { %325 = vmatprep.mubr.msk.bf16.mxu1 %vm176_vm1, %v336_v18  ;;  %s291_s8 = sshll.u32 %s361_s3, 4  ;;  %s292_s8 = int_to_ptr.vmem [resolvable:$true] %s291_s8 }
  0x11   :  { %s338_s6 = scalar_lea.vmem %s292_s8, 16  ;;  %s342_s9 = scalar_lea.vmem %s292_s8, 32 }
  0x12   :  { %158 = vperm.xlu0 %331, %v144_v11   ;;  %p339_p0 = scmp.ne.s32.totalorder %s292_s8, %s338_s6  ;;  %p343_p1 = scmp.lt.s32.totalorder %s292_s8, %s292_s8 }
  0x13   :  { %163 = vperm.xlu1 %332, %v145_v12   ;;  %p344_p2 = scmp.lt.s32.totalorder %s342_s9, %s338_s6 }
  0x15   :  { %p345_p3 = por %p344_p2, %p343_p1 }
  0x16   :  { %242 = vperm.xlu0 %331, %v236_v13  }
  0x17   :  { %247 = vperm.xlu1 %332, %v237_v14   ;;  %p346_p4 = pnand %p345_p3, %p339_p0 }
  0x1a   :  { %252 = vperm.xlu0 %331, %v238_v15  }
  0x1b   :  { %257 = vperm.xlu1 %332, %v239_v16  }
  0x1e   :  { %276 = vperm.xlu0 %331, %v273_v17  }
  0x81   :  { %v53_v19 = vpop.permute.xlu0 %52 }
  0x82   :  { %v43_v20 = vpop.permute.xlu1 %42 }
  0x85   :  { %v58_v24 = vpop.permute.xlu0 %57 }
  0x86   :  { %v48_v28 = vpop.permute.xlu1 %47 }
  0x89   :  { %v149_v38 = vpop.permute.xlu0 %148 }
  0x8a   :  { %v154_v39 = vpop.permute.xlu1 %153 }
  0x8d   :  { %v159_v40 = vpop.permute.xlu0 %158 }
  0x8e   :  { %v164_v42 = vpop.permute.xlu1 %163 }
  0x91   :  { %v243_v47 = vpop.permute.xlu0 %242 }
  0x92   :  { %v248_v52 = vpop.permute.xlu1 %247 }
  0x95   :  { %v253_v58 = vpop.permute.xlu0 %252 }
  0x96   :  { %v258_v61 = vpop.permute.xlu1 %257 }
  0x99   :  { %v277_v8 = vpop.permute.xlu0 %276 }
  0x9a   :  { %v282_v10 = vrot.slane %v277_v8, %v281_v6 }
  0xc8   :  { %v319_v21 = vpop.f32.mrf.mxu0 }
  0xc9   :  { %v126_v23 = vadd.f32 %v319_v21, %v53_v19 }
  0xca   :  { %v117_v22 = vpop.f32.mrf.mxu0 }
  0xcb   :  { %v118_v26 = vadd.f32 %v117_v22, %v43_v20  ;;  %v134_v30 = vmax.f32 %v126_v23, 0.0 }
  0xcc   :  { %v320_v25 = vpop.f32.mrf.mxu0 }
  0xcd   :  { %v129_v27 = vadd.f32 %v320_v25, %v58_v24  ;;  %v132_v33 = vmax.f32 %v118_v26, 0.0 }
  0xce   :  { %v120_v29 = vpop.f32.mrf.mxu0 }
  0xcf   :  { %v135_v31 = vmax.f32 %v129_v27, 0.0  ;;  %v121_v32 = vadd.f32 %v120_v29, %v48_v28 }
  0xd1   :  { %v133_v34 = vmax.f32 %v121_v32, 0.0  ;;  %v141_v35 = vpack.c.bf16 %v135_v31, %v134_v30 }
  0xd3   :  { %v140_v36 = vpack.c.bf16 %v133_v34, %v132_v33  ;;  %321 = vmatprep.subr.bf16.mxu1 %v141_v35 }
  0xd4   :  { %322 = vmatpush3.bf16.msra.mxu1 %v141_v35 }
  0xd5   :  { %323 = vmatprep.subr.bf16.mxu1 %v140_v36 }
  0xd8   :  { %324 = vmatpush3.bf16.msra.mxu1 %v140_v36 }
  0xdb   :  { %326 = vmatmul.mubr.msk.bf16.vlgmr.msra.gmra.mxu1 %vm176_vm1, %v337_v37 }
 0x19b   :  { %v327_v41 = vpop.f32.mrf.mxu1 }
 0x19c   :  { %v226_v46 = vadd.f32 %v327_v41, %v159_v40 }
 0x19d   :  { %v217_v43 = vpop.f32.mrf.mxu1 }
 0x19e   :  { %v218_v44 = vadd.f32 %v217_v43, %v149_v38  ;;  %v234_v53 = vmax.f32 %v226_v46, 0.0 }
 0x19f   :  { %v328_v45 = vpop.f32.mrf.mxu1 }
 0x1a0   :  { %v232_v49 = vmax.f32 %v218_v44, 0.0  ;;  %v229_v50 = vadd.f32 %v328_v45, %v164_v42  ;;  %v262_v59 = vmul.f32 %v253_v58, %v234_v53 }
 0x1a1   :  { %v220_v48 = vpop.f32.mrf.mxu1 }
 0x1a2   :  { %v221_v51 = vadd.f32 %v220_v48, %v154_v39  ;;  %v260_v55 = vmul.f32 %v243_v47, %v232_v49  ;;  %v235_v56 = vmax.f32 %v229_v50, 0.0 }
 0x1a4   :  { %v233_v54 = vmax.f32 %v221_v51, 0.0  ;;  %v263_v62 = vmul.f32 %v258_v61, %v235_v56 }
 0x1a6   :  { %v261_v57 = vmul.f32 %v248_v52, %v233_v54 }
 0x1a8   :  { %v264_v60 = vadd.f32 %v261_v57, %v260_v55 }
 0x1aa   :  { %v265_v63 = vadd.f32 %v264_v60, %v262_v59 }
 0x1ac   :  { %v266_v1 = vadd.f32 %v265_v63, %v263_v62 }
 0x1ae   :  { %v267_v2 = vrot.slane %v266_v1, 4 }
 0x1b0   :  { %v268_v4 = vadd.f32 %v267_v2, %v266_v1 }
 0x1b2   :  { %v269_v5 = vrot.slane %v268_v4, 2 }
 0x1b4   :  { %v270_v7 = vadd.f32 %v269_v5, %v268_v4 }
 0x1b6   :  { %v271_v9 = vrot.slane %v270_v7, 1 }
 0x1b8   :  { %v272_v11 = vadd.f32 %v271_v9, %v270_v7 }
 0x1ba   :  { %v283_v12 = vadd.f32 %v282_v10, %v272_v11 }
 0x1bc   :  { %284 = vst [vmem:[#allocation3] sm:$0x1] %v283_v12 }
 0x1bd   :  { %349 = shalt.err (!%p346_p4)
}
 0x1be   :  { %294 = dma.vmem_to_hbm [thread:$0]  %s292_s8, 16, %s468_s7, [#allocation4]  }
 0x1bf   :  { %358 = dma.done.wait [#allocation4], 16  }
 0x1c0   :  { %359 = vsyncadd [#allocation4], 4294967280 }
 0x1c1   :  { %298 = vsyncpa [#allocation4], 1 }

</bundles_post_ra>
